<compile_context>
chip_gen: v6e
topology: v6e:2x2x1
jax: 0.10.0
libtpu: 0.0.40
codegen_flags: <defaults>
</compile_context>

<pallas_src>
import jax
import jax.numpy as jnp
from jax.experimental import pallas as pl
from jax.experimental.pallas import tpu as pltpu

IN_FEATURES = 28
HIDDEN = 80
OUT_FEATURES = 4


def _sigmoid(z):
    # Exact sigmoid via one EUP push (tanh) + two cheap VPU ops.
    return 0.5 * jnp.tanh(0.5 * z) + 0.5


def _mlp_kernel(x_ref, w1_ref, b1_ref, w2_ref, b2_ref, o_ref):
    # fc1: (TB, 28) f32 @ (28, 80) f32 -> f32, bias + sigmoid.
    h = _sigmoid(
        jnp.dot(x_ref[...], w1_ref[...], preferred_element_type=jnp.float32)
        + b1_ref[...])
    # fc2: (TB, 80) f32 @ (80, 4) f32 -> f32, bias + sigmoid.
    y = jnp.dot(h, w2_ref[...], preferred_element_type=jnp.float32) + b2_ref[...]
    o_ref[...] = _sigmoid(y)


def _round_up(n, m):
    return ((n + m - 1) // m) * m


def td_gammon_forward(x, w1, b1, w2, b2, *, block_b=8192):
    """x: (B, 28) f32. w1: (28, 80), b1: (1, 80), w2: (80, 4), b2: (1, 4).

    Returns (B, 4) f32.
    """
    B = x.shape[0]
    x = jnp.asarray(x, jnp.float32)
    w1 = jnp.asarray(w1, jnp.float32)
    b1 = jnp.asarray(b1, jnp.float32).reshape(1, HIDDEN)
    w2 = jnp.asarray(w2, jnp.float32)
    b2 = jnp.asarray(b2, jnp.float32).reshape(1, OUT_FEATURES)

    # Enforce a sublane-friendly tile (multiple of 16 rows, >= 16).
    block_b = max(16, (block_b // 16) * 16)
    b_min = _round_up(B, 16)
    # Aim for >= 2 grid steps so ("parallel",) uses both TensorCores on v7x.
    target = _round_up(pl.cdiv(b_min, 2), 16) if b_min >= 32 else b_min
    tb = min(block_b, target)
    b_pad = _round_up(B, tb)

    xp = x if b_pad == B else jnp.pad(x, ((0, b_pad - B), (0, 0)))
    grid = (b_pad // tb,)

    resident = lambda shape: pl.BlockSpec(shape, lambda i: (0, 0))

    cost = pl.CostEstimate(
        flops=2 * b_pad * (IN_FEATURES * HIDDEN + HIDDEN * OUT_FEATURES),
        transcendentals=b_pad * (HIDDEN + OUT_FEATURES),
        bytes_accessed=(b_pad * IN_FEATURES * 4            # x read
                        + b_pad * OUT_FEATURES * 4          # y write
                        + (w1.size + w2.size + b1.size + b2.size) * 4),
    )

    out = pl.pallas_call(
        _mlp_kernel,
        grid=grid,
        in_specs=[
            pl.BlockSpec((tb, IN_FEATURES), lambda i: (i, 0)),  # streamed per step
            resident(w1.shape),                                 # VMEM-resident
            resident(b1.shape),
            resident(w2.shape),
            resident(b2.shape),
        ],
        out_specs=pl.BlockSpec((tb, OUT_FEATURES), lambda i: (i, 0)),
        out_shape=jax.ShapeDtypeStruct((b_pad, OUT_FEATURES), jnp.float32),
        compiler_params=pltpu.CompilerParams(
            dimension_semantics=("parallel",),  # megacore sharding on v7x
        ),
        cost_estimate=cost,
    )(xp, w1, b1, w2, b2)

    return out if b_pad == B else out[:B]


def init_params(key):
    """Matches nn.init.uniform_(w, -0.05, 0.05) for all params (weights & biases)."""
    k1, k2, k3, k4 = jax.random.split(key, 4)
    # PyTorch fc1.weight is (80, 28); we keep the transposed layout (28, 80).
    w1 = jax.random.uniform(k1, (IN_FEATURES, HIDDEN), jnp.float32, -0.05, 0.05)
    b1 = jax.random.uniform(k2, (1, HIDDEN), jnp.float32, -0.05, 0.05)
    w2 = jax.random.uniform(k3, (HIDDEN, OUT_FEATURES), jnp.float32, -0.05, 0.05)
    b2 = jax.random.uniform(k4, (1, OUT_FEATURES), jnp.float32, -0.05, 0.05)
    return w1, b1, w2, b2


def reference_forward(x, w1, b1, w2, b2):
    h = jax.nn.sigmoid(x @ w1 + b1)
    return jax.nn.sigmoid(h @ w2 + b2)


if __name__ == "__main__":
    key = jax.random.PRNGKey(0)
    kx, kp = jax.random.split(key)
    w1, b1, w2, b2 = init_params(kp)

    # Small batch: single grid step, exercises tail padding (8 -> 16 rows).
    B = 8
    x = jax.random.uniform(kx, (B, IN_FEATURES), jnp.float32, -1.0, 1.0)
    y = jax.block_until_ready(td_gammon_forward(x, w1, b1, w2, b2))
    y_ref = reference_forward(x, w1, b1, w2, b2)
    assert y.shape == (B, OUT_FEATURES)
    assert jnp.allclose(y, y_ref, atol=2e-3, rtol=2e-3), float(
        jnp.max(jnp.abs(y - y_ref)))

    # Multi-block grid + uneven tail: B=300, tile 128 -> grid=(3,), pad to 384.
    B2 = 300
    x2 = jax.random.uniform(jax.random.PRNGKey(1), (B2, IN_FEATURES),
                            jnp.float32, -1.0, 1.0)
    y2 = jax.block_until_ready(
        td_gammon_forward(x2, w1, b1, w2, b2, block_b=128))
    y2_ref = reference_forward(x2, w1, b1, w2, b2)
    assert y2.shape == (B2, OUT_FEATURES)
    assert jnp.allclose(y2, y2_ref, atol=2e-3, rtol=2e-3)

    # Default tile with mid-size batch: exercises the >=2-step (megacore) path.
    B3 = 1000
    x3 = jax.random.uniform(jax.random.PRNGKey(2), (B3, IN_FEATURES),
                            jnp.float32, -1.0, 1.0)
    y3 = jax.block_until_ready(td_gammon_forward(x3, w1, b1, w2, b2))
    y3_ref = reference_forward(x3, w1, b1, w2, b2)
    assert y3.shape == (B3, OUT_FEATURES)
    assert jnp.allclose(y3, y3_ref, atol=2e-3, rtol=2e-3)

    print("KERNEL_OK")
</pallas_src>

<mosaic_0001>
module attributes {stable_mosaic.version = 11 : i64} {
  func.func @_mlp_kernel(%arg0: i32, %arg1: memref<16x28xf32, #tpu.memory_space<vmem>>, %arg2: memref<28x80xf32, #tpu.memory_space<vmem>>, %arg3: memref<1x80xf32, #tpu.memory_space<vmem>>, %arg4: memref<80x4xf32, #tpu.memory_space<vmem>>, %arg5: memref<1x4xf32, #tpu.memory_space<vmem>>, %arg6: memref<16x4xf32, #tpu.memory_space<vmem>>) attributes {dimension_semantics = [#tpu.dimension_semantics<parallel>], iteration_bounds = array<i64: 1>, scalar_prefetch = 0 : i64, scratch_operands = 0 : i64, tpu.core_type = #tpu.core_type<tc>, window_params = [{transform_indices = @transform_0, window_bounds = array<i64: 16, 28>}, {pipeline_mode = #tpu.pipeline_mode<synchronous>, transform_indices = @transform_1, window_bounds = array<i64: 28, 80>}, {pipeline_mode = #tpu.pipeline_mode<synchronous>, transform_indices = @transform_2, window_bounds = array<i64: 1, 80>}, {pipeline_mode = #tpu.pipeline_mode<synchronous>, transform_indices = @transform_3, window_bounds = array<i64: 80, 4>}, {pipeline_mode = #tpu.pipeline_mode<synchronous>, transform_indices = @transform_4, window_bounds = array<i64: 1, 4>}, {transform_indices = @transform_5, window_bounds = array<i64: 16, 4>}]} {
    %c0 = arith.constant 0 : index
    %c0_0 = arith.constant 0 : index
    %0 = vector.load %arg1[%c0, %c0_0] : memref<16x28xf32, #tpu.memory_space<vmem>>, vector<16x28xf32>
    %c0_1 = arith.constant 0 : index
    %c0_2 = arith.constant 0 : index
    %1 = vector.load %arg2[%c0_1, %c0_2] : memref<28x80xf32, #tpu.memory_space<vmem>>, vector<28x80xf32>
    %cst = arith.constant dense<0.000000e+00> : vector<16x80xf32>
    %2 = tpu.matmul %0, %1, %cst {dimension_numbers = #tpu.dot_dimension_numbers<[1], [0], [0], [1], [0, 0, 1, 1], [], []>} : vector<16x28xf32>, vector<28x80xf32>, vector<16x80xf32> -> vector<16x80xf32>
    %c0_3 = arith.constant 0 : index
    %c0_4 = arith.constant 0 : index
    %3 = vector.load %arg3[%c0_3, %c0_4] : memref<1x80xf32, #tpu.memory_space<vmem>>, vector<1x80xf32>
    %4 = vector.broadcast %3 : vector<1x80xf32> to vector<16x80xf32>
    %5 = arith.addf %2, %4 : vector<16x80xf32>
    %cst_5 = arith.constant 5.000000e-01 : f32
    %6 = vector.broadcast %cst_5 : f32 to vector<16x80xf32>
    %7 = arith.mulf %6, %5 : vector<16x80xf32>
    %8 = math.tanh %7 : vector<16x80xf32>
    %cst_6 = arith.constant 5.000000e-01 : f32
    %9 = vector.broadcast %cst_6 : f32 to vector<16x80xf32>
    %10 = arith.mulf %9, %8 : vector<16x80xf32>
    %cst_7 = arith.constant 5.000000e-01 : f32
    %11 = vector.broadcast %cst_7 : f32 to vector<16x80xf32>
    %12 = arith.addf %10, %11 : vector<16x80xf32>
    %c0_8 = arith.constant 0 : index
    %c0_9 = arith.constant 0 : index
    %13 = vector.load %arg4[%c0_8, %c0_9] : memref<80x4xf32, #tpu.memory_space<vmem>>, vector<80x4xf32>
    %cst_10 = arith.constant dense<0.000000e+00> : vector<16x4xf32>
    %14 = tpu.matmul %12, %13, %cst_10 {dimension_numbers = #tpu.dot_dimension_numbers<[1], [0], [0], [1], [0, 0, 1, 1], [], []>} : vector<16x80xf32>, vector<80x4xf32>, vector<16x4xf32> -> vector<16x4xf32>
    %c0_11 = arith.constant 0 : index
    %c0_12 = arith.constant 0 : index
    %15 = vector.load %arg5[%c0_11, %c0_12] : memref<1x4xf32, #tpu.memory_space<vmem>>, vector<1x4xf32>
    %16 = vector.broadcast %15 : vector<1x4xf32> to vector<16x4xf32>
    %17 = arith.addf %14, %16 : vector<16x4xf32>
    %cst_13 = arith.constant 5.000000e-01 : f32
    %18 = vector.broadcast %cst_13 : f32 to vector<16x4xf32>
    %19 = arith.mulf %18, %17 : vector<16x4xf32>
    %20 = math.tanh %19 : vector<16x4xf32>
    %cst_14 = arith.constant 5.000000e-01 : f32
    %21 = vector.broadcast %cst_14 : f32 to vector<16x4xf32>
    %22 = arith.mulf %21, %20 : vector<16x4xf32>
    %cst_15 = arith.constant 5.000000e-01 : f32
    %23 = vector.broadcast %cst_15 : f32 to vector<16x4xf32>
    %24 = arith.addf %22, %23 : vector<16x4xf32>
    %c0_16 = arith.constant 0 : index
    %c0_17 = arith.constant 0 : index
    %25 = vector.load %arg6[%c0_16, %c0_17] : memref<16x4xf32, #tpu.memory_space<vmem>>, vector<16x4xf32>
    tpu.vector_store %arg6[%c0_16, %c0_17], %24 {strides = array<i32>} : memref<16x4xf32, #tpu.memory_space<vmem>>, vector<16x4xf32>,
    return
  }
  func.func @transform_0(%arg0: i32) -> (i32, i32) {
    %c0_i32 = arith.constant 0 : i32
    %c0_i32_0 = arith.constant 0 : i32
    return %arg0, %c0_i32 : i32, i32
  }
  func.func @transform_1(%arg0: i32) -> (i32, i32) {
    %c0_i32 = arith.constant 0 : i32
    %c0_i32_0 = arith.constant 0 : i32
    %c0_i32_1 = arith.constant 0 : i32
    return %c0_i32, %c0_i32_0 : i32, i32
  }
  func.func @transform_2(%arg0: i32) -> (i32, i32) {
    %c0_i32 = arith.constant 0 : i32
    %c0_i32_0 = arith.constant 0 : i32
    %c0_i32_1 = arith.constant 0 : i32
    return %c0_i32, %c0_i32_0 : i32, i32
  }
  func.func @transform_3(%arg0: i32) -> (i32, i32) {
    %c0_i32 = arith.constant 0 : i32
    %c0_i32_0 = arith.constant 0 : i32
    %c0_i32_1 = arith.constant 0 : i32
    return %c0_i32, %c0_i32_0 : i32, i32
  }
  func.func @transform_4(%arg0: i32) -> (i32, i32) {
    %c0_i32 = arith.constant 0 : i32
    %c0_i32_0 = arith.constant 0 : i32
    %c0_i32_1 = arith.constant 0 : i32
    return %c0_i32, %c0_i32_0 : i32, i32
  }
  func.func @transform_5(%arg0: i32) -> (i32, i32) {
    %c0_i32 = arith.constant 0 : i32
    %c0_i32_0 = arith.constant 0 : i32
    return %arg0, %c0_i32 : i32, i32
  }
}

</mosaic_0001>

<bundles_post_ra>
// kernel: tpu_custom_call.1
= control target key start
LH: loop header
LB: loop body
LE: loop exit
PB: predicated region body
PF: predicated region fallthrough
CT: control target
= control target key end

     0   :  { %vm40_vm0 = vcmask 1043456   ;;  %vm33_vm1 = vcmask 228352   ;;  %vm144_vm2 = vcmask 654336   ;;  %vm234_vm3 = vcmask 31744   ;;  %s400_s1 = inlined_call_operand.vmem [shape: f32[28,80], index: 1, kind: input, shape index: {}]   ;;  %s401_s0 = inlined_call_operand.vmem [shape: f32[16,28], index: 0, kind: input, shape index: {}]   ;;  %s402_s3 = inlined_call_operand.vmem [shape: f32[80,4], index: 3, kind: input, shape index: {}]   ;;  %s403_s2 = inlined_call_operand.vmem [shape: f32[1,80], index: 2, kind: input, shape index: {}]   ;;  %s404_s4 = inlined_call_operand.vmem [shape: f32[1,4], index: 4, kind: input, shape index: {}]   ;;  %s405_s5 = inlined_call_operand.vmem [shape: f32[16,4], index: 5, kind: output, shape index: {}]  }
   0x1   :  { %v25_v0 = vld [vmem:[%s400_s1 + $0x18] sm:$0xf]  ;;  %v24_v1 = vld [vmem:[%s400_s1 + $0x10] sm:$0xff]  ;;  %v20_v2 = vld [vmem:[%s401_s0] sm:$0xff] }
   0x2   :  { %266 = vmatprep.subr.msk.mxu0 %vm40_vm0, %v25_v0  ;;  %v23_v3 = vld [vmem:[%s400_s1 + $0x8] sm:$0xff]  ;;  %274 = vmatprep.mubr.msk.f32.mxu0 %vm33_vm1, %v20_v2  ;;  %v22_v4 = vld [vmem:[%s400_s1] sm:$0xff]  ;;  %v134_v8 = vld [vmem:[%s402_s3 + $0x38] sm:$0xff] }
   0x3   :  { %267 = vmatpush3.msk.msra.mxu0 %vm40_vm0, %v25_v0  ;;  %v21_v5 = vld [vmem:[%s401_s0 + $0x8] sm:$0xff]  ;;  %v135_v7 = vld [vmem:[%s402_s3 + $0x40] sm:$0xff]  ;;  %v133_v9 = vld [vmem:[%s402_s3 + $0x30] sm:$0xff] }
   0x4   :  { %268 = vmatprep.subr.mxu0 %v24_v1  ;;  %v136_v6 = vld [vmem:[%s402_s3 + $0x48] sm:$0xff]  ;;  %v131_v11 = vld [vmem:[%s402_s3 + $0x20] sm:$0xff]  ;;  %v130_v12 = vld [vmem:[%s402_s3 + $0x18] sm:$0xff] }
   0x5   :  { %269 = vmatpush3.msra.mxu0 %v24_v1  ;;  %277 = vmatprep.subr.mxu1 %v136_v6  ;;  %v132_v10 = vld [vmem:[%s402_s3 + $0x28] sm:$0xff]  ;;  %v129_v13 = vld [vmem:[%s402_s3 + $0x10] sm:$0xff]  ;;  %v127_v15 = vld [vmem:[%s402_s3] sm:$0xff] }
   0x6   :  { %270 = vmatprep.subr.mxu0 %v23_v3  ;;  %278 = vmatpush3.msra.mxu1 %v136_v6  ;;  %v128_v14 = vld [vmem:[%s402_s3 + $0x8] sm:$0xff]  ;;  %v241_v16 = vld [vmem:[%s403_s2] ss:$0 sm:$0xff] }
   0x7   :  { %271 = vmatpush3.msra.mxu0 %v23_v3  ;;  %279 = vmatprep.subr.mxu1 %v135_v7  ;;  %v245_v29 = vld [vmem:[%s404_s4] ss:$0 sm:$0xff] }
   0x8   :  { %272 = vmatprep.subr.mxu0 %v22_v4  ;;  %280 = vmatpush3.msra.mxu1 %v135_v7 }
   0x9   :  { %273 = vmatpush3.msra.mxu0 %v22_v4  ;;  %281 = vmatprep.subr.mxu1 %v134_v8 }
   0xa   :  { %275 = vmatmul.mubr.msk.f32.vlgmr.msra.gmra.mxu0 %vm33_vm1, %v21_v5  ;;  %282 = vmatpush3.msra.mxu1 %v134_v8 }
   0xb   :  { %283 = vmatprep.subr.mxu1 %v133_v9 }
   0xc   :  { %284 = vmatpush3.msra.mxu1 %v133_v9 }
   0xd   :  { %285 = vmatprep.subr.mxu1 %v132_v10 }
   0xe   :  { %286 = vmatpush3.msra.mxu1 %v132_v10 }
   0xf   :  { %287 = vmatprep.subr.mxu1 %v131_v11 }
  0x10   :  { %288 = vmatpush3.msra.mxu1 %v131_v11 }
  0x11   :  { %289 = vmatprep.subr.mxu1 %v130_v12 }
  0x12   :  { %290 = vmatpush3.msra.mxu1 %v130_v12 }
  0x13   :  { %291 = vmatprep.subr.mxu1 %v129_v13 }
  0x14   :  { %292 = vmatpush3.msra.mxu1 %v129_v13 }
  0x15   :  { %293 = vmatprep.subr.mxu1 %v128_v14 }
  0x16   :  { %294 = vmatpush3.msra.mxu1 %v128_v14 }
  0x17   :  { %295 = vmatprep.subr.mxu1 %v127_v15 }
  0x18   :  { %296 = vmatpush3.msra.mxu1 %v127_v15 }
  0xca   :  { %v276_v17 = vpop.f32.mrf.mxu0 }
  0xcb   :  { %v116_v18 = vadd.f32 %v276_v17, %v241_v16 }
  0xcc   :  { %v110_v19 = vpop.f32.mrf.mxu0 }
  0xcd   :  { %v120_v20 = vmul.f32 0.5, %v116_v18  ;;  %v111_v21 = vadd.f32 %v241_v16, %v110_v19 }
  0xcf   :  { %300 = vtanh.f32 %v120_v20  ;;  %v119_v22 = vmul.f32 0.5, %v111_v21 }
  0xd1   :  { %302 = vtanh.f32 %v119_v22 }
  0xdc   :  { %v301_v23 = vpop.eup %300 }
  0xdd   :  { %v124_v25 = vmul.f32 0.5, %v301_v23 }
  0xde   :  { %v303_v24 = vpop.eup %302 }
  0xdf   :  { %v123_v26 = vmul.f32 0.5, %v303_v24  ;;  %v126_v28 = vadd.f32 0.5, %v124_v25 }
  0xe1   :  { %v125_v27 = vadd.f32 0.5, %v123_v26 }
  0xe3   :  { %297 = vmatprep.mubr.msk.f32.mxu1 %vm144_vm2, %v125_v27 }
  0xe4   :  { %298 = vmatmul.mubr.msk.f32.vlgmr.msra.gmra.mxu1 %vm144_vm2, %v126_v28 }
 0x1a4   :  { %v299_v30 = vpop.f32.mrf.mxu1 }
 0x1a5   :  { %v223_v31 = vadd.f32 %v299_v30, %v245_v29 }
 0x1a6   :  { %v217_v32 = vpop.f32.mrf.mxu1 }
 0x1a7   :  { %v227_v33 = vmul.f32 0.5, %v223_v31  ;;  %v218_v34 = vadd.f32 %v245_v29, %v217_v32 }
 0x1a9   :  { %304 = vtanh.f32 %v227_v33  ;;  %v226_v35 = vmul.f32 0.5, %v218_v34 }
 0x1ab   :  { %306 = vtanh.f32 %v226_v35 }
 0x1b6   :  { %v305_v36 = vpop.eup %304 }
 0x1b7   :  { %v231_v37 = vmul.f32 0.5, %v305_v36 }
 0x1b8   :  { %v307_v38 = vpop.eup %306 }
 0x1b9   :  { %v233_v39 = vadd.f32 0.5, %v231_v37  ;;  %v230_v40 = vmul.f32 0.5, %v307_v38 }
 0x1bb   :  { %236 = vst.msk [vmem:[%s405_s5 + $0x8] sm:$0xff] %vm234_vm3, %v233_v39  ;;  %v232_v41 = vadd.f32 0.5, %v230_v40 }
 0x1bd   :  { %235 = vst.msk [vmem:[%s405_s5] sm:$0xff] %vm234_vm3, %v232_v41 }

</bundles_post_ra>
